<compile_context>
chip_gen: v5e
topology: v5e:2x2
jax: 0.10.0
libtpu: 0.0.40
codegen_flags: <defaults>
</compile_context>

<pallas_src>
import jax
import jax.numpy as jnp
from jax.experimental import pallas as pl
from jax.experimental.pallas import tpu as pltpu

EPS = 1e-5  # BatchNorm1d default

# Conservative single-call VMEM ceiling: v7x has 64 MiB physical per TC; leave
# headroom for compiler scratch / double buffers.
_VMEM_CEILING_BYTES = 48 << 20


def _make_encoder_kernel(n_real, n_pad):
    """Build the kernel for a (statically known) real/padded batch size."""
    inv_n = 1.0 / float(n_real)
    n_extra = float(n_pad - n_real)
    need_fix = n_pad != n_real

    def kernel(x_ref, w_ref, gb_ref, o_ref):
        h = x_ref[...]                      # (n_pad, H) bf16, K already padded
        gb = gb_ref[...]                    # (6, H) f32: [g1,be1,g2,be2,g3,be3]
        H = gb.shape[-1]

        pad_rows = None                     # (8, H) value of every padded row
        q = None                            # (1, H) padded rows after matmul

        for l in range(3):
            w = w_ref[l]
            # Linear (no bias: BatchNorm cancels it). bf16 operands, f32 accum.
            lhs = h if h.dtype == jnp.bfloat16 else h.astype(jnp.bfloat16)
            y = jnp.dot(lhs, w, preferred_element_type=jnp.float32)

            # BatchNorm1d training-forward: biased batch stats, one pass.
            s1 = jnp.sum(y, axis=0, keepdims=True)
            s2 = jnp.sum(y * y, axis=0, keepdims=True)

            if need_fix and l > 0:
                # Every padded row is the same per-channel vector (pad_rows),
                # so its matmul output equals q exactly (same MXU numerics).
                # Remove the padded contribution from the statistics instead
                # of masking the full (n_pad, H) activation: O(H) vs O(B*H).
                q = jnp.dot(pad_rows.astype(jnp.bfloat16), w,
                            preferred_element_type=jnp.float32)[0:1, :]
                s1 = s1 - n_extra * q
                s2 = s2 - n_extra * (q * q)

            mean = s1 * inv_n
            # One-pass variance can cancel slightly negative: clamp before rsqrt.
            var = jnp.maximum(s2 * inv_n - mean * mean, 0.0)

            g = gb[2 * l:2 * l + 1, :]
            be = gb[2 * l + 1:2 * l + 2, :]
            scale = g * jax.lax.rsqrt(var + EPS)   # EUP slot
            shift = be - mean * scale
            y = y * scale + shift                  # fused affine

            if l < 2:
                y = jnp.maximum(y, 0.0)            # ReLU (last layer: none)
                if need_fix:
                    if l == 0:
                        # Layer-0 padded input rows are exactly 0 -> matmul
                        # rows are exactly 0 (no stats correction needed).
                        q = jnp.zeros((1, H), jnp.float32)
                    # Track what the padded rows became after affine + ReLU.
                    pad_rows = jnp.broadcast_to(
                        jnp.maximum(q * scale + shift, 0.0), (8, H))
            h = y

        # Padded output rows are garbage (sliced off in the wrapper).
        o_ref[...] = h.astype(o_ref.dtype)

    return kernel


def improved_encoder(x, params, out_dtype=jnp.float32):
    """x: (B, input_size) f32 -> (B, hidden_size) out_dtype.

    Single-launch, whole-batch kernel (HBM/overhead amortized over all rows).
    For tiny batches, concatenate multiple invocations' rows at the call site
    rather than tuning the kernel; for batches beyond the asserted VMEM
    ceiling, split the batch in the wrapper (see TODOs above).
    Pass out_dtype=jnp.bfloat16 to halve output writeback bytes.
    """
    B, F = x.shape
    W = params["w_stack"]          # (3, H, H) bf16, layer-0 rows zero-padded
    gb = params["gb"]              # (6, H) f32
    H = W.shape[2]
    K = W.shape[1]
    assert F <= K, "input_size must be <= hidden_size for the packed layout"

    # Pad B to a multiple of 16 so the bf16 LHS fills whole packed (16,128)
    # vregs; lane-dense, sublane-aligned bf16 input slab (wrapper-side layout
    # plumbing, halves input HBM traffic).
    B_pad = ((B + 15) // 16) * 16
    x_p = jnp.pad(x, ((0, B_pad - B), (0, K - F))).astype(jnp.bfloat16)

    # ---- VMEM budget for the single-slab design -------------------------
    out_bytes = jnp.dtype(out_dtype).itemsize
    # per row: bf16 x slab + output + ~3 live f32 intermediates + bf16 cast
    per_row = H * (2 + out_bytes + 3 * 4 + 2)
    est_vmem = int(B_pad * per_row + W.size * 2 + gb.size * 4 + (64 << 10))
    assert est_vmem <= _VMEM_CEILING_BYTES, (
        f"batch {B} (~{est_vmem >> 20} MiB VMEM) exceeds the single-slab "
        f"ceiling; split the batch in the wrapper")
    vmem_limit = int(min(_VMEM_CEILING_BYTES, max(2 * est_vmem, 32 << 20)))

    flops = int(2 * 3 * B_pad * H * K)
    bytes_accessed = int(x_p.size * 2 + W.size * 2 + gb.size * 4
                         + B_pad * H * out_bytes)

    vmem = pl.BlockSpec(memory_space=pltpu.MemorySpace.VMEM)
    out = pl.pallas_call(
        _make_encoder_kernel(B, B_pad),
        out_shape=jax.ShapeDtypeStruct((B_pad, H), out_dtype),
        in_specs=[vmem, vmem, vmem],
        out_specs=vmem,
        compiler_params=pltpu.CompilerParams(vmem_limit_bytes=vmem_limit),
        cost_estimate=pl.CostEstimate(flops=flops, transcendentals=3 * H,
                                      bytes_accessed=bytes_accessed),
    )(x_p, W, gb)
    return out[:B]


def init_params(key, input_size, hidden_size):
    """nn.Linear-style init (U(-1/sqrt(fan_in), +)); random BN affine.

    Packs everything the kernel needs into two tensors:
      w_stack: (3, H, H) bf16   (w1 zero-padded on the K axis from 112 -> 128)
      gb:      (6, H)   f32     rows = [g1, be1, g2, be2, g3, be3]
    f32 originals + biases are kept under "ref" for the pure-f32 reference only
    (the kernel drops biases because training-mode BatchNorm cancels them).
    """
    k = jax.random.split(key, 8)

    def linear(kw, kb, fan_in, fan_out):
        bound = 1.0 / (fan_in ** 0.5)
        w = jax.random.uniform(kw, (fan_in, fan_out), jnp.float32, -bound, bound)
        b = jax.random.uniform(kb, (1, fan_out), jnp.float32, -bound, bound)
        return w, b

    w1, b1 = linear(k[0], k[1], input_size, hidden_size)
    w2, b2 = linear(k[2], k[3], hidden_size, hidden_size)
    w3, b3 = linear(k[4], k[5], hidden_size, hidden_size)

    w1p = jnp.pad(w1, ((0, hidden_size - input_size), (0, 0)))
    w_stack = jnp.stack([w1p, w2, w3]).astype(jnp.bfloat16)

    g = 1.0 + 0.1 * jax.random.normal(k[6], (3, hidden_size), jnp.float32)
    be = 0.1 * jax.random.normal(k[7], (3, hidden_size), jnp.float32)
    gb = jnp.stack([g[0], be[0], g[1], be[1], g[2], be[2]])

    return {
        "w_stack": w_stack,
        "gb": gb,
        "ref": {"w1": w1, "b1": b1, "w2": w2, "b2": b2, "w3": w3, "b3": b3},
    }


def reference_mirror(x, params, input_size):
    """Pure-JAX reference mirroring the kernel numerics (bf16 matmul, no bias,
    one-pass stats, clamped var) on the real rows only — tight-tolerance check."""
    W = params["w_stack"]
    gb = params["gb"]
    H = W.shape[2]
    h = jnp.pad(x, ((0, 0), (0, H - input_size)))
    for l in range(3):
        y = jnp.dot(h.astype(jnp.bfloat16), W[l],
                    preferred_element_type=jnp.float32)
        mean = jnp.mean(y, axis=0, keepdims=True)
        var = jnp.maximum(jnp.mean(y * y, axis=0, keepdims=True) - mean * mean,
                          0.0)
        g = gb[2 * l:2 * l + 1, :]
        be = gb[2 * l + 1:2 * l + 2, :]
        scale = g * jax.lax.rsqrt(var + EPS)
        y = y * scale + (be - mean * scale)
        if l < 2:
            y = jnp.maximum(y, 0.0)
        h = y
    return h


def reference_f32(x, params):
    """Exact f32 PyTorch training-forward semantics (with Linear biases and
    two-pass biased variance) — loose-tolerance sanity check."""
    r = params["ref"]
    gb = params["gb"]

    def block(h, w, b, g, be, relu):
        y = h @ w + b
        m = jnp.mean(y, axis=0, keepdims=True)
        v = jnp.mean((y - m) ** 2, axis=0, keepdims=True)
        y = (y - m) / jnp.sqrt(v + EPS) * g + be
        return jnp.maximum(y, 0.0) if relu else y

    h = block(x, r["w1"], r["b1"], gb[0:1], gb[1:2], True)
    h = block(h, r["w2"], r["b2"], gb[2:3], gb[3:4], True)
    h = block(h, r["w3"], r["b3"], gb[4:5], gb[5:6], False)
    return h


if __name__ == "__main__":
    input_size = 112
    hidden_size = 128

    key = jax.random.PRNGKey(0)
    kx1, kx2, kp = jax.random.split(key, 3)
    params = init_params(kp, input_size, hidden_size)

    # Two batch sizes: a multiple of 16 (no padded rows) and a ragged one
    # (exercises the O(H) padded-row statistics correction).
    for batch, kx in ((32, kx1), (13, kx2)):
        x = jax.random.normal(kx, (batch, input_size), jnp.float32)

        out = jax.block_until_ready(improved_encoder(x, params))
        assert out.shape == (batch, hidden_size) and out.dtype == jnp.float32

        tight = reference_mirror(x, params, input_size)
        assert jnp.allclose(out, tight, atol=1e-3, rtol=1e-3), \
            "mismatch vs numerics-mirroring reference"

        loose = reference_f32(x, params)
        assert jnp.allclose(out, loose, atol=1e-1, rtol=1e-1), \
            "mismatch vs f32 PyTorch-semantics reference"

        # bf16-output fast path (half the writeback HBM bytes).
        out_bf16 = jax.block_until_ready(
            improved_encoder(x, params, out_dtype=jnp.bfloat16))
        assert out_bf16.shape == (batch, hidden_size)
        assert out_bf16.dtype == jnp.bfloat16
        assert jnp.allclose(out_bf16.astype(jnp.float32), tight,
                            atol=5e-2, rtol=5e-2), \
            "mismatch on bf16-output path"

    print("KERNEL_OK")
</pallas_src>

<mosaic_0001>
module attributes {stable_mosaic.version = 11 : i64} {
  func.func @kernel(%arg0: memref<32x128xbf16, #tpu.memory_space<vmem>>, %arg1: memref<3x128x128xbf16, #tpu.memory_space<vmem>>, %arg2: memref<6x128xf32, #tpu.memory_space<vmem>>, %arg3: memref<32x128xf32, #tpu.memory_space<vmem>>) attributes {dimension_semantics = [], scalar_prefetch = 0 : i64, scratch_operands = 0 : i64, tpu.core_type = #tpu.core_type<tc>} {
    %c0 = arith.constant 0 : index
    %c0_0 = arith.constant 0 : index
    %0 = vector.load %arg0[%c0, %c0_0] : memref<32x128xbf16, #tpu.memory_space<vmem>>, vector<32x128xbf16>
    %c0_1 = arith.constant 0 : index
    %c0_2 = arith.constant 0 : index
    %1 = vector.load %arg2[%c0_1, %c0_2] : memref<6x128xf32, #tpu.memory_space<vmem>>, vector<6x128xf32>
    %c0_3 = arith.constant 0 : index
    %c0_4 = arith.constant 0 : index
    %c0_5 = arith.constant 0 : index
    %2 = vector.load %arg1[%c0_3, %c0_4, %c0_5] : memref<3x128x128xbf16, #tpu.memory_space<vmem>>, vector<1x128x128xbf16>
    %3 = vector.shape_cast %2 : vector<1x128x128xbf16> to vector<128x128xbf16>
    %cst = arith.constant dense<0.000000e+00> : vector<32x128xf32>
    %4 = tpu.matmul %0, %3, %cst {dimension_numbers = #tpu.dot_dimension_numbers<[1], [0], [0], [1], [0, 0, 1, 1], [], []>} : vector<32x128xbf16>, vector<128x128xbf16>, vector<32x128xf32> -> vector<32x128xf32>
    %cst_6 = arith.constant dense<0.000000e+00> : vector<128xf32>
    %5 = vector.multi_reduction <add>, %4, %cst_6 [0] : vector<32x128xf32> to vector<128xf32>
    %6 = vector.shape_cast %5 : vector<128xf32> to vector<1x128xf32>
    %7 = arith.mulf %4, %4 : vector<32x128xf32>
    %cst_7 = arith.constant dense<0.000000e+00> : vector<128xf32>
    %8 = vector.multi_reduction <add>, %7, %cst_7 [0] : vector<32x128xf32> to vector<128xf32>
    %9 = vector.shape_cast %8 : vector<128xf32> to vector<1x128xf32>
    %cst_8 = arith.constant 3.125000e-02 : f32
    %10 = vector.broadcast %cst_8 : f32 to vector<1x128xf32>
    %11 = arith.mulf %6, %10 : vector<1x128xf32>
    %cst_9 = arith.constant 3.125000e-02 : f32
    %12 = vector.broadcast %cst_9 : f32 to vector<1x128xf32>
    %13 = arith.mulf %9, %12 : vector<1x128xf32>
    %14 = arith.mulf %11, %11 : vector<1x128xf32>
    %15 = arith.subf %13, %14 : vector<1x128xf32>
    %cst_10 = arith.constant 0.000000e+00 : f32
    %16 = vector.broadcast %cst_10 : f32 to vector<1x128xf32>
    %17 = arith.maximumf %15, %16 : vector<1x128xf32>
    %18 = vector.extract_strided_slice %1 {offsets = [0, 0], sizes = [1, 128], strides = [1, 1]} : vector<6x128xf32> to vector<1x128xf32>
    %19 = vector.extract_strided_slice %1 {offsets = [1, 0], sizes = [1, 128], strides = [1, 1]} : vector<6x128xf32> to vector<1x128xf32>
    %cst_11 = arith.constant 9.99999974E-6 : f32
    %20 = vector.broadcast %cst_11 : f32 to vector<1x128xf32>
    %21 = arith.addf %17, %20 : vector<1x128xf32>
    %22 = math.rsqrt %21 : vector<1x128xf32>
    %23 = arith.mulf %18, %22 : vector<1x128xf32>
    %24 = arith.mulf %11, %23 : vector<1x128xf32>
    %25 = arith.subf %19, %24 : vector<1x128xf32>
    %26 = vector.broadcast %23 : vector<1x128xf32> to vector<32x128xf32>
    %27 = arith.mulf %4, %26 : vector<32x128xf32>
    %28 = vector.broadcast %25 : vector<1x128xf32> to vector<32x128xf32>
    %29 = arith.addf %27, %28 : vector<32x128xf32>
    %cst_12 = arith.constant 0.000000e+00 : f32
    %30 = vector.broadcast %cst_12 : f32 to vector<32x128xf32>
    %31 = arith.maximumf %29, %30 : vector<32x128xf32>
    %c1 = arith.constant 1 : index
    %c0_13 = arith.constant 0 : index
    %c0_14 = arith.constant 0 : index
    %32 = vector.load %arg1[%c1, %c0_13, %c0_14] : memref<3x128x128xbf16, #tpu.memory_space<vmem>>, vector<1x128x128xbf16>
    %33 = vector.shape_cast %32 : vector<1x128x128xbf16> to vector<128x128xbf16>
    %34 = arith.truncf %31 : vector<32x128xf32> to vector<32x128xbf16>
    %cst_15 = arith.constant dense<0.000000e+00> : vector<32x128xf32>
    %35 = tpu.matmul %34, %33, %cst_15 {dimension_numbers = #tpu.dot_dimension_numbers<[1], [0], [0], [1], [0, 0, 1, 1], [], []>} : vector<32x128xbf16>, vector<128x128xbf16>, vector<32x128xf32> -> vector<32x128xf32>
    %cst_16 = arith.constant dense<0.000000e+00> : vector<128xf32>
    %36 = vector.multi_reduction <add>, %35, %cst_16 [0] : vector<32x128xf32> to vector<128xf32>
    %37 = vector.shape_cast %36 : vector<128xf32> to vector<1x128xf32>
    %38 = arith.mulf %35, %35 : vector<32x128xf32>
    %cst_17 = arith.constant dense<0.000000e+00> : vector<128xf32>
    %39 = vector.multi_reduction <add>, %38, %cst_17 [0] : vector<32x128xf32> to vector<128xf32>
    %40 = vector.shape_cast %39 : vector<128xf32> to vector<1x128xf32>
    %cst_18 = arith.constant 3.125000e-02 : f32
    %41 = vector.broadcast %cst_18 : f32 to vector<1x128xf32>
    %42 = arith.mulf %37, %41 : vector<1x128xf32>
    %cst_19 = arith.constant 3.125000e-02 : f32
    %43 = vector.broadcast %cst_19 : f32 to vector<1x128xf32>
    %44 = arith.mulf %40, %43 : vector<1x128xf32>
    %45 = arith.mulf %42, %42 : vector<1x128xf32>
    %46 = arith.subf %44, %45 : vector<1x128xf32>
    %cst_20 = arith.constant 0.000000e+00 : f32
    %47 = vector.broadcast %cst_20 : f32 to vector<1x128xf32>
    %48 = arith.maximumf %46, %47 : vector<1x128xf32>
    %49 = vector.extract_strided_slice %1 {offsets = [2, 0], sizes = [1, 128], strides = [1, 1]} : vector<6x128xf32> to vector<1x128xf32>
    %50 = vector.extract_strided_slice %1 {offsets = [3, 0], sizes = [1, 128], strides = [1, 1]} : vector<6x128xf32> to vector<1x128xf32>
    %cst_21 = arith.constant 9.99999974E-6 : f32
    %51 = vector.broadcast %cst_21 : f32 to vector<1x128xf32>
    %52 = arith.addf %48, %51 : vector<1x128xf32>
    %53 = math.rsqrt %52 : vector<1x128xf32>
    %54 = arith.mulf %49, %53 : vector<1x128xf32>
    %55 = arith.mulf %42, %54 : vector<1x128xf32>
    %56 = arith.subf %50, %55 : vector<1x128xf32>
    %57 = vector.broadcast %54 : vector<1x128xf32> to vector<32x128xf32>
    %58 = arith.mulf %35, %57 : vector<32x128xf32>
    %59 = vector.broadcast %56 : vector<1x128xf32> to vector<32x128xf32>
    %60 = arith.addf %58, %59 : vector<32x128xf32>
    %cst_22 = arith.constant 0.000000e+00 : f32
    %61 = vector.broadcast %cst_22 : f32 to vector<32x128xf32>
    %62 = arith.maximumf %60, %61 : vector<32x128xf32>
    %c2 = arith.constant 2 : index
    %c0_23 = arith.constant 0 : index
    %c0_24 = arith.constant 0 : index
    %63 = vector.load %arg1[%c2, %c0_23, %c0_24] : memref<3x128x128xbf16, #tpu.memory_space<vmem>>, vector<1x128x128xbf16>
    %64 = vector.shape_cast %63 : vector<1x128x128xbf16> to vector<128x128xbf16>
    %65 = arith.truncf %62 : vector<32x128xf32> to vector<32x128xbf16>
    %cst_25 = arith.constant dense<0.000000e+00> : vector<32x128xf32>
    %66 = tpu.matmul %65, %64, %cst_25 {dimension_numbers = #tpu.dot_dimension_numbers<[1], [0], [0], [1], [0, 0, 1, 1], [], []>} : vector<32x128xbf16>, vector<128x128xbf16>, vector<32x128xf32> -> vector<32x128xf32>
    %cst_26 = arith.constant dense<0.000000e+00> : vector<128xf32>
    %67 = vector.multi_reduction <add>, %66, %cst_26 [0] : vector<32x128xf32> to vector<128xf32>
    %68 = vector.shape_cast %67 : vector<128xf32> to vector<1x128xf32>
    %69 = arith.mulf %66, %66 : vector<32x128xf32>
    %cst_27 = arith.constant dense<0.000000e+00> : vector<128xf32>
    %70 = vector.multi_reduction <add>, %69, %cst_27 [0] : vector<32x128xf32> to vector<128xf32>
    %71 = vector.shape_cast %70 : vector<128xf32> to vector<1x128xf32>
    %cst_28 = arith.constant 3.125000e-02 : f32
    %72 = vector.broadcast %cst_28 : f32 to vector<1x128xf32>
    %73 = arith.mulf %68, %72 : vector<1x128xf32>
    %cst_29 = arith.constant 3.125000e-02 : f32
    %74 = vector.broadcast %cst_29 : f32 to vector<1x128xf32>
    %75 = arith.mulf %71, %74 : vector<1x128xf32>
    %76 = arith.mulf %73, %73 : vector<1x128xf32>
    %77 = arith.subf %75, %76 : vector<1x128xf32>
    %cst_30 = arith.constant 0.000000e+00 : f32
    %78 = vector.broadcast %cst_30 : f32 to vector<1x128xf32>
    %79 = arith.maximumf %77, %78 : vector<1x128xf32>
    %80 = vector.extract_strided_slice %1 {offsets = [4, 0], sizes = [1, 128], strides = [1, 1]} : vector<6x128xf32> to vector<1x128xf32>
    %81 = vector.extract_strided_slice %1 {offsets = [5, 0], sizes = [1, 128], strides = [1, 1]} : vector<6x128xf32> to vector<1x128xf32>
    %cst_31 = arith.constant 9.99999974E-6 : f32
    %82 = vector.broadcast %cst_31 : f32 to vector<1x128xf32>
    %83 = arith.addf %79, %82 : vector<1x128xf32>
    %84 = math.rsqrt %83 : vector<1x128xf32>
    %85 = arith.mulf %80, %84 : vector<1x128xf32>
    %86 = arith.mulf %73, %85 : vector<1x128xf32>
    %87 = arith.subf %81, %86 : vector<1x128xf32>
    %88 = vector.broadcast %85 : vector<1x128xf32> to vector<32x128xf32>
    %89 = arith.mulf %66, %88 : vector<32x128xf32>
    %90 = vector.broadcast %87 : vector<1x128xf32> to vector<32x128xf32>
    %91 = arith.addf %89, %90 : vector<32x128xf32>
    %c0_32 = arith.constant 0 : index
    %c0_33 = arith.constant 0 : index
    %92 = vector.load %arg3[%c0_32, %c0_33] : memref<32x128xf32, #tpu.memory_space<vmem>>, vector<32x128xf32>
    tpu.vector_store %arg3[%c0_32, %c0_33], %91 {strides = array<i32>} : memref<32x128xf32, #tpu.memory_space<vmem>>, vector<32x128xf32>,
    return
  }
}

</mosaic_0001>

<bundles_post_ra>
// kernel: tpu_custom_call.1
= control target key start
LH: loop header
LB: loop body
LE: loop exit
PB: predicated region body
PF: predicated region fallthrough
CT: control target
= control target key end

     0   :  { %8 = vsyncpa [#allocation3], 0  ;;  %s864_s0 = inlined_call_operand.hbm [shape: bf16[32,128], index: 0, kind: input, shape index: {}]   ;;  %s865_s1 = inlined_call_operand.hbm [shape: bf16[3,128,128], index: 1, kind: input, shape index: {}]   ;;  %s866_s2 = inlined_call_operand.hbm [shape: f32[6,128], index: 2, kind: input, shape index: {}]   ;;  %s867_s3 = inlined_call_operand.hbm [shape: f32[32,128], index: 3, kind: output, shape index: {}]  }
   0x1   :  { %9 = vsyncpa [#allocation6], 0 }
   0x2   :  { %10 = vsyncpa [#allocation4], 0  ;;  %s28_s14 = sshll.u32 %s865_s1, 4  ;;  %s780_s15 = smov [#allocation5]   ;;  %s29_s14 = int_to_ptr.hbm [resolvable:$true] %s28_s14 }
   0x3   :  { %s30_s16 = sshll.u32 %s780_s15, 4  ;;  %s15_s19 = sshll.u32 %s864_s0, 4  ;;  %s31_s16 = int_to_ptr.vmem [resolvable:$true] %s30_s16  ;;  %s16_s19 = int_to_ptr.hbm [resolvable:$true] %s15_s19 }
   0x4   :  { %s781_s20 = smov 64   ;;  %s782_s21 = smov 4  }
   0x5   :  { %36 = dma.hbm_to_vmem [thread:$0]  %s29_s14, 3072, %s31_s16, [#allocation6], %s781_s20, %s781_s20, %s782_s21  }
   0x6   :  { %s783_s22 = smov [#allocation2]   ;;  %s42_s26 = sshll.u32 %s866_s2, 4  ;;  %s43_s26 = int_to_ptr.hbm [resolvable:$true] %s42_s26 }
   0x7   :  { %s17_s23 = sshll.u32 %s783_s22, 4  ;;  %s784_s1 = smov [#allocation7]   ;;  %s18_s23 = int_to_ptr.vmem [resolvable:$true] %s17_s23 }
   0x8   :  { %23 = dma.hbm_to_vmem [thread:$0]  %s16_s19, 256, %s18_s23, [#allocation3], %s781_s20, %s781_s20, %s782_s21  }
   0x9   :  { %s44_s27 = sshll.u32 %s784_s1, 4  ;;  %s45_s27 = int_to_ptr.vmem [resolvable:$true] %s44_s27 }
   0xa   :  { %47 = dma.hbm_to_vmem [thread:$0]  %s43_s26, 128, %s45_s27, [#allocation6]  }
   0xb   :  { %774 = dma.done.wait [#allocation3], 256  }
   0xc   :  { %775 = vsyncadd [#allocation3], 4294967040 }
   0xd   :  { %776 = dma.done.wait [#allocation6], 3200  }
   0xe   :  { %777 = vsyncadd [#allocation6], 4294964096  ;;  %v639_v0 = vld [vmem:[#allocation5 + $0x38] sm:$0xff]  ;;  %v638_v1 = vld [vmem:[#allocation5 + $0x30] sm:$0xff]  ;;  %s785_s0 = smov [#allocation8]   ;;  %s512_s30 = sshll.u32 %s867_s3, 4  ;;  %s513_s30 = int_to_ptr.hbm [resolvable:$true] %s512_s30 }
   0xf   :  { %141 = vmatpush.bf16.msra.mxu0 %v639_v0  ;;  %656 = vmatpush.bf16.msra.mxu3 %v639_v0  ;;  %v637_v2 = vld [vmem:[#allocation5 + $0x28] sm:$0xff]  ;;  %v636_v3 = vld [vmem:[#allocation5 + $0x20] sm:$0xff]  ;;  %v635_v4 = vld [vmem:[#allocation5 + $0x18] sm:$0xff]  ;;  %s510_s2 = sshll.u32 %s785_s0, 4  ;;  %s786_s4 = smov 128   ;;  %s511_s2 = int_to_ptr.vmem [resolvable:$true] %s510_s2 }
  0x10   :  { %v634_v5 = vld [vmem:[#allocation5 + $0x10] sm:$0xff]  ;;  %v633_v6 = vld [vmem:[#allocation5 + $0x8] sm:$0xff]  ;;  %v632_v7 = vld [vmem:[#allocation5] sm:$0xff]  ;;  %s787_s5 = smov 8  }
  0x11   :  { %v630_v8 = vld [vmem:[#allocation2] sm:$0xff]  ;;  %v631_v9 = vld [vmem:[#allocation2 + $0x8] sm:$0xff]  ;;  %v645_v25 = vld [vmem:[#allocation5 + $0x68] sm:$0xff] }
  0x12   :  { %v647_v13 = vld [vmem:[#allocation5 + $0x78] sm:$0xff]  ;;  %v646_v18 = vld [vmem:[#allocation5 + $0x70] sm:$0xff]  ;;  %v644_v30 = vld [vmem:[#allocation5 + $0x60] sm:$0xff] }
  0x13   :  { %142 = vmatpush.bf16.msra.mxu0 %v638_v1  ;;  %657 = vmatpush.bf16.msra.mxu3 %v638_v1  ;;  %v643_v35 = vld [vmem:[#allocation5 + $0x58] sm:$0xff]  ;;  %v642_v40 = vld [vmem:[#allocation5 + $0x50] sm:$0xff]  ;;  %v641_v45 = vld [vmem:[#allocation5 + $0x48] sm:$0xff] }
  0x14   :  { %285 = vmatpush.bf16.msra.mxu1 %v647_v13  ;;  %v640_v48 = vld [vmem:[#allocation5 + $0x40] sm:$0xff] }
  0x15   :  { %v832_v55 = vld [vmem:[#allocation7] sm:$0x3f] }
  0x17   :  { %143 = vmatpush.bf16.msra.mxu0 %v637_v2  ;;  %658 = vmatpush.bf16.msra.mxu3 %v637_v2 }
  0x18   :  { %286 = vmatpush.bf16.msra.mxu1 %v646_v18 }
  0x1b   :  { %144 = vmatpush.bf16.msra.mxu0 %v636_v3  ;;  %659 = vmatpush.bf16.msra.mxu3 %v636_v3 }
  0x1c   :  { %287 = vmatpush.bf16.msra.mxu1 %v645_v25 }
  0x1f   :  { %145 = vmatpush.bf16.msra.mxu0 %v635_v4  ;;  %660 = vmatpush.bf16.msra.mxu3 %v635_v4 }
  0x20   :  { %288 = vmatpush.bf16.msra.mxu1 %v644_v30 }
  0x23   :  { %146 = vmatpush.bf16.msra.mxu0 %v634_v5  ;;  %661 = vmatpush.bf16.msra.mxu3 %v634_v5 }
  0x24   :  { %289 = vmatpush.bf16.msra.mxu1 %v643_v35 }
  0x27   :  { %147 = vmatpush.bf16.msra.mxu0 %v633_v6  ;;  %662 = vmatpush.bf16.msra.mxu3 %v633_v6 }
  0x28   :  { %290 = vmatpush.bf16.msra.mxu1 %v642_v40 }
  0x2b   :  { %148 = vmatpush.bf16.msra.mxu0 %v632_v7  ;;  %663 = vmatpush.bf16.msra.mxu3 %v632_v7 }
  0x2c   :  { %291 = vmatpush.bf16.msra.mxu1 %v641_v45 }
  0x2e   :  { %149 = vmatmul.bf16.vlgmr.msra.gmra.mxu0 %v630_v8  ;;  %154 = vmatmul.bf16.vlgmr.msra.gmra.mxu3 %v631_v9 }
  0x30   :  { %292 = vmatpush.bf16.msra.mxu1 %v640_v48 }
  0xab   :  { %v817_v10 = vpop.f32.mrf.mxu0 }
  0xac   :  { %v169_v14 = vmul.f32 %v817_v10, %v817_v10 }
  0xb1   :  { %v819_v11 = vpop.f32.mrf.mxu3 }
  0xb2   :  { %v171_v19 = vmul.f32 %v819_v11, %v819_v11 }
  0xb3   :  { %v821_v12 = vpop.f32.mrf.mxu0 }
  0xb4   :  { %v160_v15 = vadd.f32 %v821_v12, %v817_v10  ;;  %v170_v16 = vmul.f32 %v821_v12, %v821_v12 }
  0xb6   :  { %v173_v17 = vadd.f32 %v170_v16, %v169_v14  ;;  %v161_v20 = vadd.f32 %v160_v15, %v819_v11 }
  0xb8   :  { %v174_v24 = vadd.f32 %v173_v17, %v171_v19 }
  0xb9   :  { %v157_v21 = vpop.f32.mrf.mxu3 }
  0xba   :  { %v162_v22 = vadd.f32 %v161_v20, %v157_v21  ;;  %v172_v23 = vmul.f32 %v157_v21, %v157_v21 }
  0xbc   :  { %v163_v26 = vrot.slane %v162_v22, 4  ;;  %v175_v27 = vadd.f32 %v174_v24, %v172_v23  ;;  %v654_v24 = vld [vmem:[#allocation5 + $0xb0] sm:$0xff] }
  0xbe   :  { %v164_v28 = vadd.f32 %v163_v26, %v162_v22  ;;  %v176_v29 = vrot.slane %v175_v27, 4 }
  0xc0   :  { %v165_v31 = vrot.slane %v164_v28, 2  ;;  %v177_v32 = vadd.f32 %v176_v29, %v175_v27 }
  0xc2   :  { %v166_v33 = vadd.f32 %v165_v31, %v164_v28  ;;  %v178_v34 = vrot.slane %v177_v32, 2  ;;  %v653_v31 = vld [vmem:[#allocation5 + $0xa8] sm:$0xff] }
  0xc4   :  { %v167_v36 = vrot.slane %v166_v33, 1  ;;  %v179_v37 = vadd.f32 %v178_v34, %v177_v32 }
  0xc6   :  { %v168_v38 = vadd.f32 %v167_v36, %v166_v33  ;;  %v180_v39 = vrot.slane %v179_v37, 1  ;;  %v652_v36 = vld [vmem:[#allocation5 + $0xa0] sm:$0xff] }
  0xc8   :  { %v181_v41 = vadd.f32 %v180_v39, %v179_v37  ;;  %v182_v42 = vmul.f32 0.03125, %v168_v38 }
  0xca   :  { %v183_v43 = vmul.f32 0.03125, %v181_v41  ;;  %v184_v44 = vmul.f32 %v182_v42, %v182_v42  ;;  %v651_v41 = vld [vmem:[#allocation5 + $0x98] sm:$0xff] }
  0xcc   :  { %v185_v46 = vsub.f32 %v183_v43, %v184_v44 }
  0xce   :  { %v186_v47 = vmax.f32 %v185_v46, 0.0  ;;  %v650_v46 = vld [vmem:[#allocation5 + $0x90] sm:$0xff] }
  0xd0   :  { %v187_v49 = vadd.f32 1e-05, %v186_v47 }
  0xd2   :  { %672 = vrsqrt.f32 %v187_v49  ;;  %vm194_vm1 = vweird.f32 %v187_v49 }
  0xd8   :  { %v673_v50 = vpop.eup %672 }
  0xd9   :  { %v189_v51 = vmul.f32 %v673_v50, %v187_v49  ;;  %vm195_vm0 = vweird.f32 %v673_v50 }
  0xda   :  { %vm196_vm2 = vmor %vm194_vm1, %vm195_vm0 }
  0xdb   :  { %v190_v52 = vmul.f32 %v673_v50, %v189_v51 }
  0xdd   :  { %v191_v53 = vmul.f32 0.5, %v190_v52  ;;  %v648_v52 = vld [vmem:[#allocation5 + $0x80] sm:$0xff] }
  0xdf   :  { %v192_v54 = vsub.f32 1.5, %v191_v53 }
  0xe1   :  { %v193_v56 = vmul.f32 %v673_v50, %v192_v54 }
  0xe3   :  { %v197_v57 = vsel %vm196_vm2, %v673_v50, %v193_v56  ;;  %v649_v50 = vld [vmem:[#allocation5 + $0x88] sm:$0xff] }
  0xe4   :  { %v198_v58 = vmul.f32 %v197_v57, %v832_v55 }
  0xe6   :  { %v199_v59 = vmul.f32 %v198_v58, %v182_v42  ;;  %v204_v60 = vperm.slane %v198_v58, 0 }
  0xe8   :  { %v201_v61 = vrot.slane %v199_v59, 7  ;;  %v208_v63 = vmul.f32 %v204_v60, %v157_v21  ;;  %v205_v1 = vmul.f32 %v204_v60, %v817_v10  ;;  %v206_v2 = vmul.f32 %v204_v60, %v821_v12  ;;  %v655_v12 = vld [vmem:[#allocation5 + $0xb8] sm:$0xff] }
  0xe9   :  { %v207_v3 = vmul.f32 %v204_v60, %v819_v11  ;;  %429 = vmatpush.bf16.msra.mxu2 %v655_v12 }
  0xea   :  { %v203_v62 = vsub.f32 %v832_v55, %v201_v61 }
  0xec   :  { %v209_v0 = vperm.slane %v203_v62, 1 }
  0xed   :  { %430 = vmatpush.bf16.msra.mxu2 %v654_v24 }
  0xee   :  { %v213_v4 = vadd.f32 %v209_v0, %v208_v63  ;;  %v210_v5 = vadd.f32 %v209_v0, %v205_v1  ;;  %v211_v6 = vadd.f32 %v209_v0, %v206_v2  ;;  %v212_v7 = vadd.f32 %v209_v0, %v207_v3 }
  0xf0   :  { %v214_v8 = vmax.f32 %v210_v5, 0.0  ;;  %v215_v9 = vmax.f32 %v211_v6, 0.0  ;;  %v216_v13 = vmax.f32 %v212_v7, 0.0  ;;  %v217_v14 = vmax.f32 %v213_v4, 0.0 }
  0xf1   :  { %431 = vmatpush.bf16.msra.mxu2 %v653_v31 }
  0xf2   :  { %v235_v15 = vpack.c.bf16 %v215_v9, %v214_v8  ;;  %v236_v16 = vpack.c.bf16 %v217_v14, %v216_v13 }
  0xf4   :  { %293 = vmatmul.bf16.vlgmr.msra.gmra.mxu1 %v235_v15 }
  0xf5   :  { %432 = vmatpush.bf16.msra.mxu2 %v652_v36 }
  0xf9   :  { %433 = vmatpush.bf16.msra.mxu2 %v651_v41 }
  0xfd   :  { %434 = vmatpush.bf16.msra.mxu2 %v650_v46 }
 0x101   :  { %435 = vmatpush.bf16.msra.mxu2 %v649_v50 }
 0x104   :  { %298 = vmatmul.bf16.gmra.mxu1 %v236_v16 }
 0x105   :  { %436 = vmatpush.bf16.msra.mxu2 %v648_v52 }
 0x171   :  { %v839_v17 = vpop.f32.mrf.mxu1 }
 0x172   :  { %v313_v19 = vmul.f32 %v839_v17, %v839_v17 }
 0x179   :  { %v841_v18 = vpop.f32.mrf.mxu1 }
 0x17a   :  { %v314_v11 = vmul.f32 %v841_v18, %v841_v18  ;;  %v304_v20 = vadd.f32 %v841_v18, %v839_v17 }
 0x17c   :  { %v317_v22 = vadd.f32 %v314_v11, %v313_v19 }
 0x181   :  { %v843_v10 = vpop.f32.mrf.mxu1 }
 0x182   :  { %v315_v21 = vmul.f32 %v843_v10, %v843_v10  ;;  %v305_v23 = vadd.f32 %v304_v20, %v843_v10 }
 0x184   :  { %v318_v26 = vadd.f32 %v317_v22, %v315_v21 }
 0x189   :  { %v301_v25 = vpop.f32.mrf.mxu1 }
 0x18a   :  { %v306_v27 = vadd.f32 %v305_v23, %v301_v25  ;;  %v316_v28 = vmul.f32 %v301_v25, %v301_v25 }
 0x18c   :  { %v307_v29 = vrot.slane %v306_v27, 4  ;;  %v319_v30 = vadd.f32 %v318_v26, %v316_v28 }
 0x18e   :  { %v308_v32 = vadd.f32 %v307_v29, %v306_v27  ;;  %v320_v33 = vrot.slane %v319_v30, 4 }
 0x190   :  { %v309_v34 = vrot.slane %v308_v32, 2  ;;  %v321_v35 = vadd.f32 %v320_v33, %v319_v30 }
 0x192   :  { %v310_v37 = vadd.f32 %v309_v34, %v308_v32  ;;  %v322_v38 = vrot.slane %v321_v35, 2 }
 0x194   :  { %v311_v39 = vrot.slane %v310_v37, 1  ;;  %v323_v40 = vadd.f32 %v322_v38, %v321_v35 }
 0x196   :  { %v312_v42 = vadd.f32 %v311_v39, %v310_v37  ;;  %v324_v43 = vrot.slane %v323_v40, 1 }
 0x198   :  { %v325_v44 = vadd.f32 %v324_v43, %v323_v40  ;;  %v326_v45 = vmul.f32 0.03125, %v312_v42 }
 0x19a   :  { %v327_v47 = vmul.f32 0.03125, %v325_v44  ;;  %v328_v48 = vmul.f32 %v326_v45, %v326_v45 }
 0x19c   :  { %v329_v49 = vsub.f32 %v327_v47, %v328_v48 }
 0x19e   :  { %v330_v51 = vmax.f32 %v329_v49, 0.0 }
 0x1a0   :  { %v331_v53 = vadd.f32 1e-05, %v330_v51 }
 0x1a2   :  { %674 = vrsqrt.f32 %v331_v53  ;;  %vm338_vm4 = vweird.f32 %v331_v53 }
 0x1a8   :  { %v675_v54 = vpop.eup %674 }
 0x1a9   :  { %v333_v56 = vmul.f32 %v675_v54, %v331_v53  ;;  %vm339_vm3 = vweird.f32 %v675_v54 }
 0x1aa   :  { %vm340_vm5 = vmor %vm338_vm4, %vm339_vm3 }
 0x1ab   :  { %v334_v57 = vmul.f32 %v675_v54, %v333_v56 }
 0x1ad   :  { %v335_v58 = vmul.f32 0.5, %v334_v57 }
 0x1af   :  { %v336_v59 = vsub.f32 1.5, %v335_v58 }
 0x1b1   :  { %v337_v60 = vmul.f32 %v675_v54, %v336_v59 }
 0x1b3   :  { %v341_v61 = vsel %vm340_vm5, %v675_v54, %v337_v60 }
 0x1b4   :  { %v342_v62 = vmul.f32 %v341_v61, %v832_v55 }
 0x1b6   :  { %v343_v63 = vmul.f32 %v342_v62, %v326_v45  ;;  %v348_v0 = vperm.slane %v342_v62, 2 }
 0x1b8   :  { %v345_v1 = vrot.slane %v343_v63, 7  ;;  %v352_v3 = vmul.f32 %v348_v0, %v301_v25  ;;  %v349_v5 = vmul.f32 %v348_v0, %v839_v17  ;;  %v350_v6 = vmul.f32 %v348_v0, %v841_v18 }
 0x1b9   :  { %v351_v7 = vmul.f32 %v348_v0, %v843_v10 }
 0x1ba   :  { %v347_v2 = vsub.f32 %v832_v55, %v345_v1 }
 0x1bc   :  { %v353_v4 = vperm.slane %v347_v2, 3 }
 0x1be   :  { %v357_v8 = vadd.f32 %v353_v4, %v352_v3  ;;  %v354_v9 = vadd.f32 %v353_v4, %v349_v5  ;;  %v355_v13 = vadd.f32 %v353_v4, %v350_v6  ;;  %v356_v14 = vadd.f32 %v353_v4, %v351_v7 }
 0x1c0   :  { %v358_v15 = vmax.f32 %v354_v9, 0.0  ;;  %v359_v16 = vmax.f32 %v355_v13, 0.0  ;;  %v360_v11 = vmax.f32 %v356_v14, 0.0  ;;  %v361_v12 = vmax.f32 %v357_v8, 0.0 }
 0x1c2   :  { %v379_v19 = vpack.c.bf16 %v359_v16, %v358_v15  ;;  %v380_v20 = vpack.c.bf16 %v361_v12, %v360_v11 }
 0x1c4   :  { %437 = vmatmul.bf16.vlgmr.msra.gmra.mxu2 %v379_v19 }
 0x1d4   :  { %442 = vmatmul.bf16.gmra.mxu2 %v380_v20 }
 0x247   :  { %v438_v21 = vpop.f32.mrf.mxu2 }
 0x248   :  { %v457_v24 = vmul.f32 %v438_v21, %v438_v21 }
 0x24f   :  { %v440_v22 = vpop.f32.mrf.mxu2 }
 0x250   :  { %v458_v17 = vmul.f32 %v440_v22, %v440_v22  ;;  %v448_v18 = vadd.f32 %v440_v22, %v438_v21 }
 0x252   :  { %v461_v10 = vadd.f32 %v458_v17, %v457_v24 }
 0x257   :  { %v443_v23 = vpop.f32.mrf.mxu2 }
 0x258   :  { %v459_v25 = vmul.f32 %v443_v23, %v443_v23  ;;  %v449_v26 = vadd.f32 %v448_v18, %v443_v23 }
 0x25a   :  { %v462_v28 = vadd.f32 %v461_v10, %v459_v25 }
 0x25f   :  { %v445_v27 = vpop.f32.mrf.mxu2 }
 0x260   :  { %v450_v29 = vadd.f32 %v449_v26, %v445_v27  ;;  %v460_v30 = vmul.f32 %v445_v27, %v445_v27 }
 0x262   :  { %v451_v31 = vrot.slane %v450_v29, 4  ;;  %v463_v32 = vadd.f32 %v462_v28, %v460_v30 }
 0x264   :  { %v452_v33 = vadd.f32 %v451_v31, %v450_v29  ;;  %v464_v34 = vrot.slane %v463_v32, 4 }
 0x266   :  { %v453_v35 = vrot.slane %v452_v33, 2  ;;  %v465_v36 = vadd.f32 %v464_v34, %v463_v32 }
 0x268   :  { %v454_v37 = vadd.f32 %v453_v35, %v452_v33  ;;  %v466_v38 = vrot.slane %v465_v36, 2 }
 0x26a   :  { %v455_v39 = vrot.slane %v454_v37, 1  ;;  %v467_v40 = vadd.f32 %v466_v38, %v465_v36 }
 0x26c   :  { %v456_v41 = vadd.f32 %v455_v39, %v454_v37  ;;  %v468_v42 = vrot.slane %v467_v40, 1 }
 0x26e   :  { %v469_v43 = vadd.f32 %v468_v42, %v467_v40  ;;  %v470_v44 = vmul.f32 0.03125, %v456_v41 }
 0x270   :  { %v471_v45 = vmul.f32 0.03125, %v469_v43  ;;  %v472_v46 = vmul.f32 %v470_v44, %v470_v44 }
 0x272   :  { %v473_v47 = vsub.f32 %v471_v45, %v472_v46 }
 0x274   :  { %v474_v48 = vmax.f32 %v473_v47, 0.0 }
 0x276   :  { %v475_v49 = vadd.f32 1e-05, %v474_v48 }
 0x278   :  { %676 = vrsqrt.f32 %v475_v49  ;;  %vm482_vm7 = vweird.f32 %v475_v49 }
 0x27e   :  { %v677_v50 = vpop.eup %676 }
 0x27f   :  { %v477_v51 = vmul.f32 %v677_v50, %v475_v49  ;;  %vm483_vm6 = vweird.f32 %v677_v50 }
 0x280   :  { %vm484_vm8 = vmor %vm482_vm7, %vm483_vm6 }
 0x281   :  { %v478_v52 = vmul.f32 %v677_v50, %v477_v51 }
 0x283   :  { %v479_v53 = vmul.f32 0.5, %v478_v52 }
 0x285   :  { %v480_v54 = vsub.f32 1.5, %v479_v53 }
 0x287   :  { %v481_v56 = vmul.f32 %v677_v50, %v480_v54 }
 0x289   :  { %v485_v57 = vsel %vm484_vm8, %v677_v50, %v481_v56 }
 0x28a   :  { %v486_v58 = vmul.f32 %v485_v57, %v832_v55 }
 0x28c   :  { %v487_v59 = vmul.f32 %v486_v58, %v470_v44  ;;  %v492_v61 = vperm.slane %v486_v58, 4 }
 0x28e   :  { %v489_v60 = vrot.slane %v487_v59, 7  ;;  %v493_v63 = vmul.f32 %v492_v61, %v438_v21  ;;  %v494_v0 = vmul.f32 %v492_v61, %v440_v22  ;;  %v496_v1 = vmul.f32 %v492_v61, %v445_v27 }
 0x28f   :  { %v495_v3 = vmul.f32 %v492_v61, %v443_v23 }
 0x290   :  { %v491_v62 = vsub.f32 %v832_v55, %v489_v60 }
 0x292   :  { %v497_v2 = vperm.slane %v491_v62, 5 }
 0x294   :  { %v498_v4 = vadd.f32 %v497_v2, %v493_v63  ;;  %v499_v5 = vadd.f32 %v497_v2, %v494_v0  ;;  %v501_v6 = vadd.f32 %v497_v2, %v496_v1  ;;  %v500_v7 = vadd.f32 %v497_v2, %v495_v3 }
 0x296   :  { %505 = vst [vmem:[#allocation8 + $0x18] sm:$0xff] %v501_v6 }
 0x297   :  { %502 = vst [vmem:[#allocation8] sm:$0xff] %v498_v4 }
 0x298   :  { %503 = vst [vmem:[#allocation8 + $0x8] sm:$0xff] %v499_v5 }
 0x299   :  { %504 = vst [vmem:[#allocation8 + $0x10] sm:$0xff] %v500_v7 }
 0x29a   :  { %518 = dma.vmem_to_hbm [thread:$0]  %s511_s2, 512, %s513_s30, [#allocation4], %s786_s4, %s786_s4, %s787_s5  }
 0x29b   :  { %778 = dma.done.wait [#allocation4], 512  }
 0x29c   :  { %779 = vsyncadd [#allocation4], 4294966784 }
 0x29d   :  { %523 = vsyncpa [#allocation3], 1 }
 0x29e   :  { %524 = vsyncpa [#allocation6], 1 }
 0x29f   :  { %525 = vsyncpa [#allocation4], 1 }

</bundles_post_ra>
